<compile_context>
chip_gen: v5e
topology: v5e:2x2
jax: 0.10.0
libtpu: 0.0.40
codegen_flags: <defaults>
</compile_context>

<pallas_src>
import functools
import math

import jax
import jax.numpy as jnp
from jax.experimental import pallas as pl
from jax.experimental.pallas import tpu as pltpu


def _mixer_kernel(x_ref, wt_ref, bt_ref, wc_ref, bc_ref, o_ref,
                  *, t_blk, ti_axis, channels, b_blk, block_diag):
    """One grid step = one (token-row block) x (batch lane-group).

    x_ref  : (T, n_blk)       packed bf16 input (c fastest within each batch)
    wt_ref : (t_blk, T)       token-mixer weight rows, bf16
    bt_ref : (t_blk, 1)       token-mixer bias (free lane broadcast)
    wc_ref : (n_blk, n_blk)   block-diagonal channel weight (w_ch.T copies), bf16
             or (C, C)        plain w_ch.T when C % 128 == 0
    bc_ref : (1, n_blk)       channel-mixer bias tiled across packed batches
    o_ref  : (t_blk, n_blk)   output block (lane-dense)
    """
    ti = pl.program_id(ti_axis)

    # --- token mixer: single lane-dense matmul over all packed batches --------
    # y[r, b*C + c] = sum_s wt[t0+r, s] * x[b, s, c] + bt[t0+r]
    y = jnp.dot(wt_ref[...], x_ref[...], preferred_element_type=jnp.float32)
    y = y + bt_ref[...]                      # (t_blk, 1) broadcast along lanes
    y16 = y.astype(jnp.bfloat16)

    # --- channel mixer ---------------------------------------------------------
    if block_diag:
        # z[r, b*C + c] = sum_d y[r, b*C + d] * w_ch[c, d]; wc is block-diag(w_ch.T)
        z = jnp.dot(y16, wc_ref[...], preferred_element_type=jnp.float32)
    else:
        # C % 128 == 0: per-batch dots on 128-aligned lane slices.
        wc = wc_ref[...]
        parts = []
        for b in range(b_blk):
            lo = b * channels
            parts.append(jnp.dot(y16[:, lo:lo + channels], wc,
                                 preferred_element_type=jnp.float32))
        z = parts[0] if b_blk == 1 else jnp.concatenate(parts, axis=1)
    z = z + bc_ref[...]                      # + bc[c]

    # token_demixer / affine_transform / norm_layer = Identity
    # residual_layer = Identity -> residual is the raw input rows of this block
    row0 = pl.multiple_of(ti * t_blk, t_blk)
    x_rows = x_ref[pl.ds(row0, t_blk), :].astype(jnp.float32)
    s = z + x_rows

    # exact GELU (erf form), matching torch.nn.functional.gelu default
    inv_sqrt2 = jnp.float32(1.0 / math.sqrt(2.0))
    out = 0.5 * s * (1.0 + jax.lax.erf(s * inv_sqrt2))

    o_ref[...] = out.astype(o_ref.dtype)     # lane-dense, unmasked store


def _plan_lanes(B, C, *, target_lanes=512, lane_align=128):
    """Pick (b_blk, B_pad) so that n_blk = b_blk*C is a multiple of lane_align
    (padding the batch if needed), n_blk <= ~target_lanes, and b_blk | B_pad."""
    g = math.gcd(C, lane_align)
    step = lane_align // g                    # min batches/block for aligned lanes
    b_cover = -(-B // step) * step            # batches covering B, rounded to step
    b_want = max(step, (max(1, target_lanes // C) // step) * step)
    b_blk = min(b_want, b_cover)
    B_pad = -(-B // b_blk) * b_blk
    if B_pad > 2 * B and B * C <= target_lanes:
        # Padding overhead too high for a tiny problem: use the full packed
        # width (legal: block spans the whole lane axis).
        return B, B
    return b_blk, B_pad


def _choose_t_blk(T, n_blk, *, max_epilogue_elems=1 << 16):
    """Largest divisor of T (multiple of 8) keeping the f32 epilogue working set
    (several live (t_blk, n_blk) temporaries) bounded.  No gratuitous splitting."""
    if T % 8 != 0:
        return T                               # full dim is always legal
    cap = max(8, min(T, max_epilogue_elems // max(1, n_blk)))
    cap = (cap // 8) * 8 or 8
    best = 8
    for t in range(8, T + 1, 8):
        if T % t == 0 and t <= cap:
            best = t
    return best


def _vmem_limit_bytes(T, t_blk, n_blk, wc_dim, out_elem_bytes):
    """Double-buffered tile working set + epilogue temps, with headroom,
    clamped to a v7x-safe ceiling only when actually needed."""
    need = 2 * (T * n_blk * 2            # packed x, bf16
                + t_blk * T * 2          # wt row slab, bf16
                + t_blk * 4              # bt
                + wc_dim * wc_dim * 2    # channel weight, bf16
                + n_blk * 4              # bc
                + t_blk * n_blk * out_elem_bytes)   # output block
    need += 6 * t_blk * n_blk * 4        # live f32 epilogue temporaries
    limit = int(need * 1.5) + (4 << 20)
    return max(16 << 20, min(100 << 20, limit))


@functools.partial(jax.jit, static_argnames=("resolution",))
def equi_mixer_block(x, w_tok, b_tok, w_ch, b_ch, *, resolution):
    """x: (B, H, W, C) channels-last.  Returns same shape/dtype."""
    B, H, W, C = x.shape
    assert (H, W) == tuple(resolution)
    T = H * W

    b_blk, B_pad = _plan_lanes(B, C)
    n_blk = b_blk * C
    nb = B_pad // b_blk
    n_total = B_pad * C
    t_blk = _choose_t_blk(T, n_blk)
    nt = T // t_blk

    # Pack the batch into the lane axis (once, in XLA, outside the kernel):
    # (B,H,W,C) -> (B,T,C) -> pad batch -> (T,B_pad,C) -> (T, B_pad*C), bf16.
    xb = x.reshape(B, T, C)
    if B_pad != B:
        xb = jnp.pad(xb, ((0, B_pad - B), (0, 0), (0, 0)))
    x_pack = xb.transpose(1, 0, 2).reshape(T, n_total).astype(jnp.bfloat16)

    # Parameter plumbing (once, in XLA): bf16 MXU operands, (T,1) token bias,
    # channel bias tiled across one lane-group, block-diagonal channel weight.
    wt_bf16 = w_tok.astype(jnp.bfloat16)                                 # (T, T)
    bt_col = b_tok.reshape(T, 1).astype(jnp.float32)                     # (T, 1)
    bc_pack = jnp.tile(b_ch.reshape(1, C).astype(jnp.float32), (1, b_blk))  # (1, n_blk)

    block_diag = (C % 128 != 0)
    if block_diag:
        wc_kernel = jnp.kron(jnp.eye(b_blk, dtype=jnp.float32),
                             w_ch.T.astype(jnp.float32)).astype(jnp.bfloat16)
        wc_dim = n_blk
    else:
        wc_kernel = w_ch.T.astype(jnp.bfloat16)
        wc_dim = C

    # Grid-axis order by HBM traffic: keep the bigger of {token weight, packed x}
    # resident across the inner axis.
    x_bytes = T * n_total * 2
    wt_bytes = T * T * 2
    order_a = (x_bytes + nb * wt_bytes) <= (wt_bytes + nt * x_bytes)
    grid = (nb, nt) if order_a else (nt, nb)
    ti_axis = 1 if order_a else 0

    def wrap(f):
        if order_a:
            return lambda jb, ti: f(jb, ti)
        return lambda ti, jb: f(jb, ti)

    in_specs = [
        pl.BlockSpec((T, n_blk), wrap(lambda jb, ti: (0, jb))),      # packed x
        pl.BlockSpec((t_blk, T), wrap(lambda jb, ti: (ti, 0))),      # wt rows
        pl.BlockSpec((t_blk, 1), wrap(lambda jb, ti: (ti, 0))),      # bt rows
        pl.BlockSpec((wc_dim, wc_dim), wrap(lambda jb, ti: (0, 0))), # channel W
        pl.BlockSpec((1, n_blk), wrap(lambda jb, ti: (0, 0))),       # bc
    ]
    out_spec = pl.BlockSpec((t_blk, n_blk), wrap(lambda jb, ti: (ti, jb)))

    kernel = functools.partial(
        _mixer_kernel, t_blk=t_blk, ti_axis=ti_axis,
        channels=C, b_blk=b_blk, block_diag=block_diag)

    out_pack = pl.pallas_call(
        kernel,
        out_shape=jax.ShapeDtypeStruct((T, n_total), x.dtype),
        grid_spec=pltpu.PrefetchScalarGridSpec(
            num_scalar_prefetch=0,
            grid=grid,
            in_specs=in_specs,
            out_specs=out_spec,
        ),
        compiler_params=pltpu.CompilerParams(
            dimension_semantics=("parallel", "parallel"),
            vmem_limit_bytes=_vmem_limit_bytes(T, t_blk, n_blk, wc_dim,
                                               x.dtype.itemsize),
        ),
    )(x_pack, wt_bf16, bt_col, wc_kernel, bc_pack)

    # Unpack: (T, B_pad*C) -> (B_pad, T, C) -> drop padding -> (B, H, W, C)
    out = out_pack.reshape(T, B_pad, C).transpose(1, 0, 2)[:B]
    return out.reshape(B, H, W, C)


def _reference(x, w_tok, b_tok, w_ch, b_ch):
    """Pure-JAX f32 reference (exact PyTorch-module semantics)."""
    B, H, W, C = x.shape
    T = H * W
    xf = x.reshape(B, T, C).astype(jnp.float32)
    y = jnp.einsum("ts,bsc->btc", w_tok, xf) + b_tok[None, :, None]
    z = jnp.einsum("btd,cd->btc", y, w_ch) + b_ch[None, None, :]
    s = z + xf
    out = 0.5 * s * (1.0 + jax.lax.erf(s / jnp.sqrt(jnp.float32(2.0))))
    return out.reshape(B, H, W, C).astype(x.dtype)


if __name__ == "__main__":
    # Small shapes consistent with the module: embed_size=32, resolution=(4, 4)
    B, H, W, C = 2, 4, 4, 32
    T = H * W

    key = jax.random.PRNGKey(0)
    kx, kwt, kbt, kwc, kbc = jax.random.split(key, 5)

    x = jax.random.normal(kx, (B, H, W, C), dtype=jnp.float32)
    # Deterministic synthetic parameters (no checkpoint load).
    w_tok = jax.random.normal(kwt, (T, T), dtype=jnp.float32) * (1.0 / math.sqrt(T))
    b_tok = jax.random.normal(kbt, (T,), dtype=jnp.float32) * 0.01
    w_ch = jax.random.normal(kwc, (C, C), dtype=jnp.float32) * (1.0 / math.sqrt(C))
    b_ch = jax.random.normal(kbc, (C,), dtype=jnp.float32) * 0.01

    out = equi_mixer_block(x, w_tok, b_tok, w_ch, b_ch, resolution=(H, W))
    out = jax.block_until_ready(out)

    ref = _reference(x, w_tok, b_tok, w_ch, b_ch)
    assert out.shape == (B, H, W, C)
    # bf16 MXU operands / bf16 packed activations with f32 accumulation.
    assert jnp.allclose(out, ref, atol=5e-2, rtol=5e-2), "mismatch vs reference"

    print("KERNEL_OK")
</pallas_src>

<mosaic_0001>
module attributes {stable_mosaic.version = 11 : i64} {
  func.func @_mixer_kernel(%arg0: i32, %arg1: i32, %arg2: memref<16x128xbf16, #tpu.memory_space<vmem>>, %arg3: memref<16x16xbf16, #tpu.memory_space<vmem>>, %arg4: memref<16x1xf32, #tpu.memory_space<vmem>>, %arg5: memref<128x128xbf16, #tpu.memory_space<vmem>>, %arg6: memref<1x128xf32, #tpu.memory_space<vmem>>, %arg7: memref<16x128xf32, #tpu.memory_space<vmem>>) attributes {dimension_semantics = [#tpu.dimension_semantics<parallel>, #tpu.dimension_semantics<parallel>], iteration_bounds = array<i64: 1, 1>, scalar_prefetch = 0 : i64, scratch_operands = 0 : i64, tpu.core_type = #tpu.core_type<tc>, window_params = [{transform_indices = @transform_0, window_bounds = array<i64: 16, 128>}, {transform_indices = @transform_1, window_bounds = array<i64: 16, 16>}, {transform_indices = @transform_2, window_bounds = array<i64: 16, 1>}, {pipeline_mode = #tpu.pipeline_mode<synchronous>, transform_indices = @transform_3, window_bounds = array<i64: 128, 128>}, {pipeline_mode = #tpu.pipeline_mode<synchronous>, transform_indices = @transform_4, window_bounds = array<i64: 1, 128>}, {transform_indices = @transform_5, window_bounds = array<i64: 16, 128>}]} {
    %c0 = arith.constant 0 : index
    %c0_0 = arith.constant 0 : index
    %0 = vector.load %arg3[%c0, %c0_0] : memref<16x16xbf16, #tpu.memory_space<vmem>>, vector<16x16xbf16>
    %c0_1 = arith.constant 0 : index
    %c0_2 = arith.constant 0 : index
    %1 = vector.load %arg2[%c0_1, %c0_2] : memref<16x128xbf16, #tpu.memory_space<vmem>>, vector<16x128xbf16>
    %cst = arith.constant dense<0.000000e+00> : vector<16x128xf32>
    %2 = tpu.matmul %0, %1, %cst {dimension_numbers = #tpu.dot_dimension_numbers<[1], [0], [0], [1], [0, 0, 1, 1], [], []>} : vector<16x16xbf16>, vector<16x128xbf16>, vector<16x128xf32> -> vector<16x128xf32>
    %c0_3 = arith.constant 0 : index
    %c0_4 = arith.constant 0 : index
    %3 = vector.load %arg4[%c0_3, %c0_4] : memref<16x1xf32, #tpu.memory_space<vmem>>, vector<16x1xf32>
    %4 = vector.broadcast %3 : vector<16x1xf32> to vector<16x128xf32>
    %5 = arith.addf %2, %4 : vector<16x128xf32>
    %6 = arith.truncf %5 : vector<16x128xf32> to vector<16x128xbf16>
    %c0_5 = arith.constant 0 : index
    %c0_6 = arith.constant 0 : index
    %7 = vector.load %arg5[%c0_5, %c0_6] : memref<128x128xbf16, #tpu.memory_space<vmem>>, vector<128x128xbf16>
    %cst_7 = arith.constant dense<0.000000e+00> : vector<16x128xf32>
    %8 = tpu.matmul %6, %7, %cst_7 {dimension_numbers = #tpu.dot_dimension_numbers<[1], [0], [0], [1], [0, 0, 1, 1], [], []>} : vector<16x128xbf16>, vector<128x128xbf16>, vector<16x128xf32> -> vector<16x128xf32>
    %c0_8 = arith.constant 0 : index
    %c0_9 = arith.constant 0 : index
    %9 = vector.load %arg6[%c0_8, %c0_9] : memref<1x128xf32, #tpu.memory_space<vmem>>, vector<1x128xf32>
    %10 = vector.broadcast %9 : vector<1x128xf32> to vector<16x128xf32>
    %11 = arith.addf %8, %10 : vector<16x128xf32>
    %c16_i32 = arith.constant 16 : i32
    %12 = arith.muli %arg1, %c16_i32 : i32
    %13 = tpu.assume_multiple %12, 16 : i32
    %14 = arith.index_cast %13 : i32 to index
    %c0_10 = arith.constant 0 : index
    %15 = vector.load %arg2[%14, %c0_10] : memref<16x128xbf16, #tpu.memory_space<vmem>>, vector<16x128xbf16>
    %16 = arith.extf %15 : vector<16x128xbf16> to vector<16x128xf32>
    %17 = arith.addf %11, %16 : vector<16x128xf32>
    %cst_11 = arith.constant 5.000000e-01 : f32
    %18 = vector.broadcast %cst_11 : f32 to vector<16x128xf32>
    %19 = arith.mulf %18, %17 : vector<16x128xf32>
    %cst_12 = arith.constant 0.707106769 : f32
    %20 = vector.broadcast %cst_12 : f32 to vector<16x128xf32>
    %21 = arith.mulf %17, %20 : vector<16x128xf32>
    %22 = math.erf %21 : vector<16x128xf32>
    %cst_13 = arith.constant 1.000000e+00 : f32
    %23 = vector.broadcast %cst_13 : f32 to vector<16x128xf32>
    %24 = arith.addf %23, %22 : vector<16x128xf32>
    %25 = arith.mulf %19, %24 : vector<16x128xf32>
    %c0_14 = arith.constant 0 : index
    %c0_15 = arith.constant 0 : index
    %26 = vector.load %arg7[%c0_14, %c0_15] : memref<16x128xf32, #tpu.memory_space<vmem>>, vector<16x128xf32>
    tpu.vector_store %arg7[%c0_14, %c0_15], %25 {strides = array<i32>} : memref<16x128xf32, #tpu.memory_space<vmem>>, vector<16x128xf32>,
    return
  }
  func.func @transform_0(%arg0: i32, %arg1: i32) -> (i32, i32) {
    %c0_i32 = arith.constant 0 : i32
    %c0_i32_0 = arith.constant 0 : i32
    return %c0_i32, %arg0 : i32, i32
  }
  func.func @transform_1(%arg0: i32, %arg1: i32) -> (i32, i32) {
    %c0_i32 = arith.constant 0 : i32
    %c0_i32_0 = arith.constant 0 : i32
    return %arg1, %c0_i32 : i32, i32
  }
  func.func @transform_2(%arg0: i32, %arg1: i32) -> (i32, i32) {
    %c0_i32 = arith.constant 0 : i32
    %c0_i32_0 = arith.constant 0 : i32
    return %arg1, %c0_i32 : i32, i32
  }
  func.func @transform_3(%arg0: i32, %arg1: i32) -> (i32, i32) {
    %c0_i32 = arith.constant 0 : i32
    %c0_i32_0 = arith.constant 0 : i32
    %c0_i32_1 = arith.constant 0 : i32
    return %c0_i32, %c0_i32_0 : i32, i32
  }
  func.func @transform_4(%arg0: i32, %arg1: i32) -> (i32, i32) {
    %c0_i32 = arith.constant 0 : i32
    %c0_i32_0 = arith.constant 0 : i32
    %c0_i32_1 = arith.constant 0 : i32
    return %c0_i32, %c0_i32_0 : i32, i32
  }
  func.func @transform_5(%arg0: i32, %arg1: i32) -> (i32, i32) {
    %c0_i32 = arith.constant 0 : i32
    return %arg1, %arg0 : i32, i32
  }
}

</mosaic_0001>

<bundles_post_ra>
// kernel: equi_mixer_block.1
= control target key start
LH: loop header
LB: loop body
LE: loop exit
PB: predicated region body
PF: predicated region fallthrough
CT: control target
= control target key end

     0   :  { %v320_v1 = vmov 0   ;;  %vm48_vm0 = vcmask 130048   ;;  %s412_s0 = inlined_call_operand.vmem [shape: bf16[16,128], index: 0, kind: input, shape index: {}]   ;;  %s413_s1 = inlined_call_operand.vmem [shape: bf16[16,16], index: 1, kind: input, shape index: {}]   ;;  %s414_s2 = inlined_call_operand.vmem [shape: f32[16,1], index: 2, kind: input, shape index: {}]   ;;  %s415_s3 = inlined_call_operand.vmem [shape: bf16[128,128], index: 3, kind: input, shape index: {}]   ;;  %s416_s4 = inlined_call_operand.vmem [shape: f32[1,128], index: 4, kind: input, shape index: {}]   ;;  %s417_s5 = inlined_call_operand.vmem [shape: f32[16,128], index: 5, kind: output, shape index: {}]  }
   0x1   :  { %v300_v0 = vld [vmem:[%s412_s0] sm:$0xff]  ;;  %314 = vset.pattern.permute.xlu0 %v320_v1  ;;  %v308_v4 = vld [vmem:[%s415_s3 + $0x38] sm:$0xff]  ;;  %v307_v5 = vld [vmem:[%s415_s3 + $0x30] sm:$0xff] }
   0x2   :  { %v25_v2 = vld [vmem:[%s414_s2] sm:$0xff]  ;;  %59 = vmatpush.bf16.msra.mxu0 %v300_v0  ;;  %135 = vmatpush.bf16.msra.mxu1 %v308_v4  ;;  %v26_v6 = vld [vmem:[%s414_s2 + $0x8] sm:$0xff]  ;;  %v304_v9 = vld [vmem:[%s415_s3 + $0x18] sm:$0xff] }
   0x3   :  { %v299_v3 = vld [vmem:[%s413_s1] sm:$0xff]  ;;  %29 = vperm.xlu0 %314, %v25_v2   ;;  %v306_v7 = vld [vmem:[%s415_s3 + $0x28] sm:$0xff]  ;;  %v303_v10 = vld [vmem:[%s415_s3 + $0x10] sm:$0xff] }
   0x4   :  { %v305_v8 = vld [vmem:[%s415_s3 + $0x20] sm:$0xff]  ;;  %v302_v11 = vld [vmem:[%s415_s3 + $0x8] sm:$0xff] }
   0x5   :  { %264 = vmatmul.msk.bf16.vlgmr.msra.gmra.mxu0 %vm48_vm0, %v299_v3  ;;  %v301_v12 = vld [vmem:[%s415_s3] sm:$0xff] }
   0x6   :  { %136 = vmatpush.bf16.msra.mxu1 %v307_v5  ;;  %v310_v20 = vld [vmem:[%s412_s0] sm:$0xff]  }
   0x7   :  { %v315_v21 = vld [vmem:[%s416_s4] ss:$0 sm:$0xff]  ;;  %v311_v22 = vunpack.c.l.bf16 %v310_v20  ;;  %v312_v28 = vunpack.c.h.bf16 %v310_v20 }
   0xa   :  { %137 = vmatpush.bf16.msra.mxu1 %v306_v7 }
   0xb   :  { %34 = vperm.xlu0 %314, %v26_v6  }
   0xe   :  { %138 = vmatpush.bf16.msra.mxu1 %v305_v8 }
  0x12   :  { %139 = vmatpush.bf16.msra.mxu1 %v304_v9 }
  0x16   :  { %140 = vmatpush.bf16.msra.mxu1 %v303_v10 }
  0x1a   :  { %141 = vmatpush.bf16.msra.mxu1 %v302_v11 }
  0x1e   :  { %142 = vmatpush.bf16.msra.mxu1 %v301_v12 }
  0x75   :  { %v30_v13 = vpop.permute.xlu0 %29 }
  0x7d   :  { %v35_v15 = vpop.permute.xlu0 %34 }
  0x82   :  { %v61_v14 = vpop.f32.mrf.mxu0 }
  0x83   :  { %v62_v17 = vadd.f32 %v61_v14, %v30_v13 }
  0x8a   :  { %v63_v16 = vpop.f32.mrf.mxu0 }
  0x8b   :  { %v64_v18 = vadd.f32 %v63_v16, %v35_v15 }
  0x8d   :  { %v66_v19 = vpack.c.bf16 %v64_v18, %v62_v17 }
  0x8f   :  { %143 = vmatmul.bf16.vlgmr.msra.gmra.mxu1 %v66_v19 }
 0x10c   :  { %v144_v23 = vpop.f32.mrf.mxu1 }
 0x10d   :  { %v145_v24 = vadd.f32 %v315_v21, %v144_v23 }
 0x10f   :  { %v393_v25 = vadd.f32 %v311_v22, %v145_v24 }
 0x111   :  { %v162_v26 = vmul.f32 0.70710677, %v393_v25 }
 0x113   :  { %v164_v27 = vmul.f32 %v162_v26, %v162_v26 }
 0x114   :  { %v146_v29 = vpop.f32.mrf.mxu1 }
 0x115   :  { %v165_v30 = vmin.f32 %v164_v27, 16.0  ;;  %v147_v31 = vadd.f32 %v315_v21, %v146_v29 }
 0x117   :  { %v166_v32 = vmul.f32 2.1237322e-06, %v165_v30  ;;  %v177_v33 = vmul.f32 3.8918573e-05, %v165_v30  ;;  %v396_v34 = vadd.f32 %v312_v28, %v147_v31 }
 0x119   :  { %v167_v35 = vadd.f32 0.00028619796, %v166_v32  ;;  %v178_v36 = vadd.f32 0.001143296, %v177_v33  ;;  %v399_v37 = vmul.f32 0.70710677, %v396_v34 }
 0x11a   :  { %v160_v33 = vmul.f32 0.5, %v393_v25 }
 0x11b   :  { %v168_v38 = vmul.f32 %v167_v35, %v165_v30  ;;  %v179_v39 = vmul.f32 %v178_v36, %v165_v30  ;;  %v204_v40 = vmul.f32 %v399_v37, %v399_v37 }
 0x11d   :  { %v180_v41 = vadd.f32 0.014752088, %v179_v39  ;;  %v169_v42 = vadd.f32 0.0036580483, %v168_v38  ;;  %v205_v43 = vmin.f32 %v204_v40, 16.0 }
 0x11f   :  { %v181_v44 = vmul.f32 %v180_v41, %v165_v30  ;;  %v206_v45 = vmul.f32 2.1237322e-06, %v205_v43  ;;  %v217_v46 = vmul.f32 3.8918573e-05, %v205_v43  ;;  %v170_v48 = vmul.f32 %v169_v42, %v165_v30 }
 0x121   :  { %v182_v47 = vadd.f32 0.112945676, %v181_v44  ;;  %v207_v49 = vadd.f32 0.00028619796, %v206_v45  ;;  %v218_v50 = vadd.f32 0.001143296, %v217_v46 }
 0x122   :  { %v171_v55 = vadd.f32 0.05243302, %v170_v48  ;;  %v161_v44 = vmul.f32 0.5, %v396_v34 }
 0x123   :  { %v183_v51 = vmul.f32 %v182_v47, %v165_v30  ;;  %v208_v52 = vmul.f32 %v207_v49, %v205_v43  ;;  %v219_v53 = vmul.f32 %v218_v50, %v205_v43 }
 0x124   :  { %v172_v61 = vmul.f32 %v171_v55, %v165_v30 }
 0x125   :  { %v184_v54 = vadd.f32 0.4994258, %v183_v51  ;;  %v220_v56 = vadd.f32 0.014752088, %v219_v53  ;;  %v209_v58 = vadd.f32 0.0036580483, %v208_v52 }
 0x126   :  { %v173_v1 = vadd.f32 0.18741608, %v172_v61 }
 0x127   :  { %v185_v57 = vmul.f32 %v184_v54, %v165_v30  ;;  %v221_v59 = vmul.f32 %v220_v56, %v205_v43  ;;  %v210_v63 = vmul.f32 %v209_v58, %v205_v43 }
 0x128   :  { %v174_v6 = vmul.f32 %v173_v1, %v165_v30 }
 0x129   :  { %v186_v60 = vadd.f32 1.0, %v185_v57  ;;  %v222_v62 = vadd.f32 0.112945676, %v221_v59  ;;  %v211_v3 = vadd.f32 0.05243302, %v210_v63 }
 0x12a   :  { %v175_v12 = vadd.f32 1.1283791, %v174_v6 }
 0x12b   :  { %316 = vrcp.f32 %v186_v60  ;;  %v223_v0 = vmul.f32 %v222_v62, %v205_v43  ;;  %v212_v9 = vmul.f32 %v211_v3, %v205_v43  ;;  %v198_v11 = vand.u32 2147483648, %v186_v60 }
 0x12c   :  { %v196_v14 = vand.u32 2147483647, %v186_v60  ;;  %vm192_vm2 = vweird.f32 %v186_v60  ;;  %v176_v19 = vmul.f32 %v175_v12, %v162_v26 }
 0x12d   :  { %v224_v2 = vadd.f32 0.4994258, %v223_v0  ;;  %v213_v15 = vadd.f32 0.18741608, %v212_v9  ;;  %v199_v17 = vor.u32 1.1754944e-38, %v198_v11 }
 0x12e   :  { %vm197_vm4 = vcmp.eq.f32.partialorder %v196_v14, 8.507059e+37 }
 0x12f   :  { %v225_v4 = vmul.f32 %v224_v2, %v205_v43  ;;  %v214_v22 = vmul.f32 %v213_v15, %v205_v43 }
 0x131   :  { %v317_v5 = vpop.eup %316  ;;  %v226_v8 = vadd.f32 1.0, %v225_v4  ;;  %v215_v30 = vadd.f32 1.1283791, %v214_v22 }
 0x132   :  { %v188_v7 = vmul.f32 %v317_v5, %v186_v60  ;;  %vm193_vm1 = vweird.f32 %v317_v5 }
 0x133   :  { %318 = vrcp.f32 %v226_v8  ;;  %vm194_vm3 = vmor %vm192_vm2, %vm193_vm1  ;;  %v238_v29 = vand.u32 2147483648, %v226_v8  ;;  %v236_v32 = vand.u32 2147483647, %v226_v8  ;;  %vm232_vm6 = vweird.f32 %v226_v8 }
 0x134   :  { %v189_v10 = vsub.f32 1.0, %v188_v7  ;;  %v216_v39 = vmul.f32 %v215_v30, %v399_v37 }
 0x135   :  { %v239_v26 = vor.u32 1.1754944e-38, %v238_v29  ;;  %vm237_vm8 = vcmp.eq.f32.partialorder %v236_v32, 8.507059e+37 }
 0x136   :  { %v190_v13 = vmul.f32 %v317_v5, %v189_v10 }
 0x138   :  { %v191_v16 = vadd.f32 %v317_v5, %v190_v13 }
 0x139   :  { %v319_v18 = vpop.eup %318 }
 0x13a   :  { %v195_v20 = vsel %vm194_vm3, %v317_v5, %v191_v16  ;;  %v228_v23 = vmul.f32 %v319_v18, %v226_v8  ;;  %vm233_vm5 = vweird.f32 %v319_v18 }
 0x13b   :  { %v200_v21 = vsel %vm197_vm4, %v199_v17, %v195_v20  ;;  %vm234_vm7 = vmor %vm232_vm6, %vm233_vm5 }
 0x13c   :  { %v201_v24 = vmul.f32 %v200_v21, %v176_v19  ;;  %v229_v27 = vsub.f32 1.0, %v228_v23 }
 0x13e   :  { %v297_v28 = vclamps-f32 %v201_v24, 1.0  ;;  %v230_v31 = vmul.f32 %v319_v18, %v229_v27 }
 0x140   :  { %v244_v35 = vadd.f32 1.0, %v297_v28  ;;  %v231_v36 = vadd.f32 %v319_v18, %v230_v31 }
 0x142   :  { %v246_v38 = vmul.f32 %v244_v35, %v160_v33  ;;  %v235_v40 = vsel %vm234_vm7, %v319_v18, %v231_v36 }
 0x143   :  { %v240_v41 = vsel %vm237_vm8, %v239_v26, %v235_v40 }
 0x144   :  { %248 = vst [vmem:[%s417_s5] sm:$0xff] %v246_v38  ;;  %v241_v42 = vmul.f32 %v240_v41, %v216_v39 }
 0x146   :  { %v298_v43 = vclamps-f32 %v241_v42, 1.0 }
 0x148   :  { %v245_v25 = vadd.f32 1.0, %v298_v43 }
 0x14a   :  { %v247_v45 = vmul.f32 %v245_v25, %v161_v44 }
 0x14c   :  { %249 = vst [vmem:[%s417_s5 + $0x8] sm:$0xff] %v247_v45 }

</bundles_post_ra>
